<compile_context>
chip_gen: v6e
topology: v6e:2x2x1
jax: 0.10.0
libtpu: 0.0.40
codegen_flags: <defaults>
</compile_context>

<pallas_src>
import functools
import math

import jax
import jax.numpy as jnp
from jax.experimental import pallas as pl
from jax.experimental.pallas import tpu as pltpu


# --------------------------- sizing / spec helpers ---------------------------


def _tile(n, cap):
    """Largest multiple-of-8 tile <= cap that divides n, else the full extent."""
    if n <= cap:
        return n
    start = cap - (cap % 8)
    for t in range(start, 7, -8):
        if n % t == 0:
            return t
    return n


def _vmem_limit_bytes(block_bytes):
    """Scoped-VMEM budget: pipeline double-buffers blocks, so leave margin; cap
    at ~75% of physical VMEM per generation (48 MiB v7x, 96 MiB v5e/v6e)."""
    try:
        cap = int(pltpu.get_tpu_info().vmem_capacity_bytes) * 3 // 4
    except Exception:
        cap = 96 << 20
    want = 4 * int(block_bytes) + (8 << 20)
    return int(min(max(want, 32 << 20), cap))


def _weight_spec(shape):
    """BlockSpec for a grid-invariant (stationary) bf16 weight: full block with a
    constant index map.  Large stationary weights are single-buffered — the block
    index never changes, so a second pipeline buffer only wastes VMEM."""
    nbytes = math.prod(shape) * 2          # bf16
    idx = lambda *_: (0,) * len(shape)
    if nbytes >= (1 << 20):
        return pl.BlockSpec(shape, idx, pipeline_mode=pl.Buffered(1))
    return pl.BlockSpec(shape, idx)


# ----------------------------- Pallas kernels --------------------------------


def embed_pe_ln_kernel(emb_ref, pe_ref, g_ref, b_ref, o_ref, *, scale, eps):
    """Fused  emb*sqrt(D) + positional encoding + LayerNorm  on a [TS, D] tile."""
    x = emb_ref[...].astype(jnp.float32) * scale + pe_ref[...].astype(jnp.float32)
    mu = jnp.mean(x, axis=-1, keepdims=True)
    var = jnp.mean(jnp.square(x - mu), axis=-1, keepdims=True)
    y = (x - mu) * jax.lax.rsqrt(var + eps)
    o_ref[...] = (y * g_ref[...] + b_ref[...]).astype(o_ref.dtype)


def encoder_layer_kernel(xq_ref, x_ref, m_ref, wq_ref, wkv_ref, wo_ref,
                         g1_ref, bln1_ref, w1_ref, b1_ref, w2_ref, b2_ref,
                         g2_ref, bln2_ref, o_ref, *attn_refs,
                         n_head, dk, eps):
    """One fused encoder layer for a (batch element, query tile) grid point.

    xq_ref  : (Tq, D)   query-tile rows of x (residual path + Q projection)
    x_ref   : (S, D)    full sequence for this batch element (K/V source)
    m_ref   : (1, S)    key-padding mask (1 = keep, 0 = mask)
    wq_ref  : (D, D)    Q projection              (bf16)
    wkv_ref : (D, 2D)   fused K|V projection      (bf16)
    wo_ref  : (D, D)    output projection         (bf16, head-major input dim)
    g1/bln1 : (1, D)    post-attention LayerNorm gamma/beta
    w1/b1   : (D, Dh)/(1, Dh)   FFN first linear  (bf16 / f32 bias)
    w2/b2   : (Dh, D)/(1, D)    FFN second linear
    g2/bln2 : (1, D)    post-FFN LayerNorm gamma/beta
    o_ref   : (Tq, D)   output tile
    attn_refs: optionally ((H, Tq, S),) softmax attention probabilities (bf16)
    """
    D = n_head * dk
    xq = xq_ref[...].astype(jnp.float32)            # (Tq, D) residual in f32
    Tq = xq.shape[0]
    x_bf = x_ref[...].astype(jnp.bfloat16)          # (S, D)
    S = x_bf.shape[0]

    # --- fused projections: full-D MXU matmuls, f32 accumulate, bf16 results ---
    kv = jnp.dot(x_bf, wkv_ref[...],
                 preferred_element_type=jnp.float32).astype(jnp.bfloat16)   # (S, 2D)
    q2 = jnp.dot(xq.astype(jnp.bfloat16), wq_ref[...],
                 preferred_element_type=jnp.float32).astype(jnp.bfloat16)   # (Tq, D)

    q = jnp.transpose(q2.reshape(Tq, n_head, dk), (1, 0, 2))         # (H, Tq, dk)
    k = jnp.transpose(kv[:, :D].reshape(S, n_head, dk), (1, 0, 2))   # (H, S, dk)
    v = jnp.transpose(kv[:, D:].reshape(S, n_head, dk), (1, 0, 2))   # (H, S, dk)

    # Additive key-padding mask bias, computed once (hoisted out of the heads).
    mask_bias = jnp.where(m_ref[...] > 0.0, 0.0, -1e9).astype(jnp.float32)  # (1, S)
    mask_bias = mask_bias[None]                                             # (1,1,S)

    scale = 1.0 / math.sqrt(dk)
    s = jnp.einsum('hqd,hkd->hqk', q, k,
                   preferred_element_type=jnp.float32) * scale + mask_bias

    # Numerically stable softmax; divide goes to the EUP via approx reciprocal.
    s_max = jnp.max(s, axis=-1, keepdims=True)
    p_un = jnp.exp(s - s_max)
    denom = jnp.sum(p_un, axis=-1, keepdims=True)
    p = p_un * pl.reciprocal(denom, approx=True)                     # (H, Tq, S)

    if attn_refs:                                   # only when requested (bf16 out)
        attn_refs[0][...] = p.astype(attn_refs[0].dtype)

    ctx = jnp.einsum('hqk,hkd->hqd', p.astype(jnp.bfloat16), v,
                     preferred_element_type=jnp.float32).astype(jnp.bfloat16)

    # Head-major concat to (Tq, D), then ONE full-D output projection.
    ctx2d = jnp.transpose(ctx, (1, 0, 2)).reshape(Tq, D)
    attn_out = jnp.dot(ctx2d, wo_ref[...], preferred_element_type=jnp.float32)

    # Residual + post-attention LayerNorm.
    y = attn_out + xq
    mu = jnp.mean(y, axis=-1, keepdims=True)
    var = jnp.mean(jnp.square(y - mu), axis=-1, keepdims=True)
    y = (y - mu) * jax.lax.rsqrt(var + eps) * g1_ref[...] + bln1_ref[...]

    # Position-wise feed-forward + residual + post-LayerNorm.
    h = jnp.dot(y.astype(jnp.bfloat16), w1_ref[...],
                preferred_element_type=jnp.float32) + b1_ref[...]
    h = jnp.maximum(h, 0.0)
    z = jnp.dot(h.astype(jnp.bfloat16), w2_ref[...],
                preferred_element_type=jnp.float32) + b2_ref[...]
    z = z + y
    mu2 = jnp.mean(z, axis=-1, keepdims=True)
    var2 = jnp.mean(jnp.square(z - mu2), axis=-1, keepdims=True)
    z = (z - mu2) * jax.lax.rsqrt(var2 + eps) * g2_ref[...] + bln2_ref[...]

    o_ref[...] = z.astype(o_ref.dtype)


# ----------------------------- pallas_call wrappers --------------------------


def embed_pe_ln_pallas(emb, pe_s, gamma, beta, eps=1e-6):
    B, S, D = emb.shape
    ts = _tile(S, 1024)
    block_bytes = (3 * ts * D + 2 * D) * 4
    return pl.pallas_call(
        functools.partial(embed_pe_ln_kernel, scale=math.sqrt(D), eps=eps),
        out_shape=jax.ShapeDtypeStruct((B, S, D), emb.dtype),
        grid=(B, S // ts),
        in_specs=[
            pl.BlockSpec((None, ts, D), lambda b, s: (b, s, 0)),
            pl.BlockSpec((ts, D), lambda b, s: (s, 0)),
            pl.BlockSpec((1, D), lambda b, s: (0, 0)),
            pl.BlockSpec((1, D), lambda b, s: (0, 0)),
        ],
        out_specs=pl.BlockSpec((None, ts, D), lambda b, s: (b, s, 0)),
        compiler_params=pltpu.CompilerParams(
            dimension_semantics=("parallel", "parallel"),
            vmem_limit_bytes=_vmem_limit_bytes(block_bytes)),
    )(emb, pe_s, gamma, beta)


def encoder_layer_pallas(x, mask, lp, n_head, return_attn=False, eps=1e-6):
    """`lp` holds pre-packed layer weights (see pack_encoder_params)."""
    B, S, D = x.shape
    assert D % n_head == 0, "d_model must be divisible by n_head"
    dk = D // n_head
    Dh = lp["w1"].shape[1]

    tq = _tile(S, 256)          # query tile: bounds the (H, Tq, S) score block
    n_qt = S // tq

    kernel = functools.partial(encoder_layer_kernel, n_head=n_head, dk=dk, eps=eps)

    vec_d = pl.BlockSpec((1, D), lambda b, qt: (0, 0))
    in_specs = [
        pl.BlockSpec((None, tq, D), lambda b, qt: (b, qt, 0)),   # x: query tile
        pl.BlockSpec((None, S, D), lambda b, qt: (b, 0, 0)),     # x: full seq (K/V)
        pl.BlockSpec((None, 1, S), lambda b, qt: (b, 0, 0)),     # key-padding mask
        _weight_spec((D, D)),                                    # Wq
        _weight_spec((D, 2 * D)),                                # Wk|Wv fused
        _weight_spec((D, D)),                                    # Wo
        vec_d, vec_d,                                            # attn LN gamma/beta
        _weight_spec((D, Dh)),                                   # W1
        pl.BlockSpec((1, Dh), lambda b, qt: (0, 0)),             # b1
        _weight_spec((Dh, D)),                                   # W2
        vec_d,                                                   # b2
        vec_d, vec_d,                                            # ffn LN gamma/beta
    ]
    args = (x, x, mask, lp["wq"], lp["wkv"], lp["wo"],
            lp["attn_ln_g"], lp["attn_ln_b"],
            lp["w1"], lp["b1"], lp["w2"], lp["b2"],
            lp["ffn_ln_g"], lp["ffn_ln_b"])

    block_bytes = (
        (tq * D + S * D + S + tq * D) * 4                          # activations + out
        + (D * D + D * 2 * D + D * D + D * Dh + Dh * D) * 2        # bf16 weights
        + (4 * D + Dh) * 4                                         # LN params / biases
        + n_head * tq * S * 4 * 3                                  # score/prob temps
    )
    if return_attn:
        block_bytes += n_head * tq * S * 2
    cparams = pltpu.CompilerParams(
        dimension_semantics=("parallel", "parallel"),
        vmem_limit_bytes=_vmem_limit_bytes(block_bytes))

    x_out_spec = pl.BlockSpec((None, tq, D), lambda b, qt: (b, qt, 0))

    if return_attn:
        out, attn = pl.pallas_call(
            kernel,
            out_shape=(
                jax.ShapeDtypeStruct((B, S, D), x.dtype),
                jax.ShapeDtypeStruct((B, n_head, S, S), jnp.bfloat16),
            ),
            grid=(B, n_qt),
            in_specs=in_specs,
            out_specs=(
                x_out_spec,
                pl.BlockSpec((None, n_head, tq, S), lambda b, qt: (b, 0, qt, 0)),
            ),
            compiler_params=cparams,
        )(*args)
        return out, attn

    out = pl.pallas_call(
        kernel,
        out_shape=jax.ShapeDtypeStruct((B, S, D), x.dtype),
        grid=(B, n_qt),
        in_specs=in_specs,
        out_specs=x_out_spec,
        compiler_params=cparams,
    )(*args)
    return out


# ------------------------------ parameter init -------------------------------


def xavier_uniform(key, shape):
    fan_in, fan_out = shape[0], shape[1]
    bound = math.sqrt(6.0 / (fan_in + fan_out))
    return jax.random.uniform(key, shape, jnp.float32, -bound, bound)


def sinusoidal_pe(max_seq_len, d_model):
    pos = jnp.arange(max_seq_len, dtype=jnp.float32)[:, None]
    i = jnp.arange(d_model, dtype=jnp.float32)[None, :]
    angle = pos / jnp.power(10000.0, (2.0 * jnp.floor(i / 2.0)) / d_model)
    pe = jnp.where((jnp.arange(d_model) % 2) == 0, jnp.sin(angle), jnp.cos(angle))
    return pe.astype(jnp.float32)               # (max_seq_len, d_model)


def init_encoder_params(key, vocab_size, d_model, d_inner, n_layers, n_head,
                        max_seq_len, pad_idx=0):
    keys = jax.random.split(key, 1 + 6 * n_layers)
    emb = xavier_uniform(keys[0], (vocab_size, d_model))
    emb = emb.at[pad_idx].set(0.0)              # nn.Embedding padding_idx row
    params = {
        "emb": emb,
        "pe": sinusoidal_pe(max_seq_len, d_model),
        "ln_g": jnp.ones((1, d_model), jnp.float32),
        "ln_b": jnp.zeros((1, d_model), jnp.float32),
        "layers": [],
    }
    kidx = 1
    for _ in range(n_layers):
        lp = {
            "wq": xavier_uniform(keys[kidx + 0], (d_model, d_model)),
            "wk": xavier_uniform(keys[kidx + 1], (d_model, d_model)),
            "wv": xavier_uniform(keys[kidx + 2], (d_model, d_model)),
            "wo": xavier_uniform(keys[kidx + 3], (d_model, d_model)),
            "attn_ln_g": jnp.ones((1, d_model), jnp.float32),
            "attn_ln_b": jnp.zeros((1, d_model), jnp.float32),
            "w1": xavier_uniform(keys[kidx + 4], (d_model, d_inner)),
            "b1": jnp.zeros((1, d_inner), jnp.float32),
            "w2": xavier_uniform(keys[kidx + 5], (d_inner, d_model)),
            "b2": jnp.zeros((1, d_model), jnp.float32),
            "ffn_ln_g": jnp.ones((1, d_model), jnp.float32),
            "ffn_ln_b": jnp.zeros((1, d_model), jnp.float32),
        }
        params["layers"].append(lp)
        kidx += 6
    return params


def pack_encoder_params(params):
    """One-time weight packing (hoisted out of the forward pass): fuse Wk|Wv,
    cast matmul weights to bf16; LN params and biases stay f32."""
    bf = jnp.bfloat16
    packed = {
        "emb": params["emb"],
        "pe": params["pe"],
        "ln_g": params["ln_g"],
        "ln_b": params["ln_b"],
        "layers_packed": [],
    }
    for lp in params["layers"]:
        packed["layers_packed"].append({
            "wq": lp["wq"].astype(bf),
            "wkv": jnp.concatenate([lp["wk"], lp["wv"]], axis=1).astype(bf),
            "wo": lp["wo"].astype(bf),
            "attn_ln_g": lp["attn_ln_g"], "attn_ln_b": lp["attn_ln_b"],
            "w1": lp["w1"].astype(bf), "b1": lp["b1"],
            "w2": lp["w2"].astype(bf), "b2": lp["b2"],
            "ffn_ln_g": lp["ffn_ln_g"], "ffn_ln_b": lp["ffn_ln_b"],
        })
    return packed


# ------------------------------ forward pass ---------------------------------


def encoder_forward(packed, src_seq, src_mask, n_head, return_attns=False):
    B, S = src_seq.shape

    # Embedding gather (plain JAX glue), then fused scale + PE + LayerNorm kernel.
    emb = packed["emb"][src_seq]                               # (B, S, D)
    # TODO(synk): dropout treated as identity (eval / inference semantics).
    x = embed_pe_ln_pallas(emb, packed["pe"][:S], packed["ln_g"], packed["ln_b"])

    attn_list = []
    for lp in packed["layers_packed"]:
        if return_attns:
            x, attn = encoder_layer_pallas(x, src_mask, lp, n_head,
                                           return_attn=True)
            attn_list.append(attn)
        else:
            x = encoder_layer_pallas(x, src_mask, lp, n_head, return_attn=False)

    if return_attns:
        return x, attn_list
    return (x,)


# ---------------------------------- main --------------------------------------

if __name__ == "__main__":
    # Small, module-consistent shapes.
    VOCAB, D_MODEL, D_INNER = 50, 32, 64
    N_LAYERS, N_HEAD = 2, 4
    B, S, MAX_SEQ_LEN, PAD_IDX = 2, 8, 16, 0

    key = jax.random.PRNGKey(0)
    pkey, skey = jax.random.split(key)

    params = init_encoder_params(pkey, VOCAB, D_MODEL, D_INNER, N_LAYERS,
                                 N_HEAD, MAX_SEQ_LEN, pad_idx=PAD_IDX)
    packed = pack_encoder_params(params)          # hoisted, done once

    # Deterministic token ids with a couple of pads at the tail of sequence 1.
    src_seq = jax.random.randint(skey, (B, S), 1, VOCAB, dtype=jnp.int32)
    src_seq = src_seq.at[1, -2:].set(PAD_IDX)
    src_mask = (src_seq != PAD_IDX).astype(jnp.float32)[:, None, :]   # (B,1,S)

    out, attns = encoder_forward(packed, src_seq, src_mask, N_HEAD,
                                 return_attns=True)
    out = jax.block_until_ready(out)
    attns = jax.block_until_ready(attns)

    # Also exercise the attention-free fast path (no attn allocation/writeback).
    (out_noattn,) = encoder_forward(packed, src_seq, src_mask, N_HEAD,
                                    return_attns=False)
    out_noattn = jax.block_until_ready(out_noattn)

    assert out.shape == (B, S, D_MODEL)
    assert out_noattn.shape == (B, S, D_MODEL)
    assert attns[0].shape == (B, N_HEAD, S, S)
    assert bool(jnp.all(jnp.isfinite(out)))
    assert bool(jnp.all(jnp.isfinite(out_noattn)))
    assert bool(jnp.all(jnp.isfinite(attns[0].astype(jnp.float32))))
    print("KERNEL_OK")
</pallas_src>

<mosaic_0001>
module attributes {stable_mosaic.version = 11 : i64} {
  func.func @embed_pe_ln_kernel(%arg0: i32, %arg1: i32, %arg2: memref<1x8x32xf32, #tpu.memory_space<vmem>>, %arg3: memref<8x32xf32, #tpu.memory_space<vmem>>, %arg4: memref<1x32xf32, #tpu.memory_space<vmem>>, %arg5: memref<1x32xf32, #tpu.memory_space<vmem>>, %arg6: memref<1x8x32xf32, #tpu.memory_space<vmem>>) attributes {dimension_semantics = [#tpu.dimension_semantics<parallel>, #tpu.dimension_semantics<parallel>], iteration_bounds = array<i64: 2, 1>, scalar_prefetch = 0 : i64, scratch_operands = 0 : i64, tpu.core_type = #tpu.core_type<tc>, window_params = [{transform_indices = @transform_0, window_bounds = array<i64: 1, 8, 32>}, {transform_indices = @transform_1, window_bounds = array<i64: 8, 32>}, {pipeline_mode = #tpu.pipeline_mode<synchronous>, transform_indices = @transform_2, window_bounds = array<i64: 1, 32>}, {pipeline_mode = #tpu.pipeline_mode<synchronous>, transform_indices = @transform_3, window_bounds = array<i64: 1, 32>}, {transform_indices = @transform_4, window_bounds = array<i64: 1, 8, 32>}]} {
    %c0 = arith.constant 0 : index
    %c0_0 = arith.constant 0 : index
    %c0_1 = arith.constant 0 : index
    %0 = vector.load %arg2[%c0, %c0_0, %c0_1] : memref<1x8x32xf32, #tpu.memory_space<vmem>>, vector<1x8x32xf32>
    %1 = vector.shape_cast %0 : vector<1x8x32xf32> to vector<8x32xf32>
    %cst = arith.constant 5.65685415 : f32
    %2 = vector.broadcast %cst : f32 to vector<8x32xf32>
    %3 = arith.mulf %1, %2 : vector<8x32xf32>
    %c0_2 = arith.constant 0 : index
    %c0_3 = arith.constant 0 : index
    %4 = vector.load %arg3[%c0_2, %c0_3] : memref<8x32xf32, #tpu.memory_space<vmem>>, vector<8x32xf32>
    %5 = arith.addf %3, %4 : vector<8x32xf32>
    %cst_4 = arith.constant dense<0.000000e+00> : vector<8xf32>
    %6 = vector.multi_reduction <add>, %5, %cst_4 [1] : vector<8x32xf32> to vector<8xf32>
    %7 = vector.shape_cast %6 : vector<8xf32> to vector<8x1xf32>
    %cst_5 = arith.constant 3.200000e+01 : f32
    %8 = vector.broadcast %cst_5 : f32 to vector<8x1xf32>
    %9 = arith.divf %7, %8 : vector<8x1xf32>
    %10 = vector.broadcast %9 : vector<8x1xf32> to vector<8x32xf32>
    %11 = arith.subf %5, %10 : vector<8x32xf32>
    %12 = arith.mulf %11, %11 : vector<8x32xf32>
    %cst_6 = arith.constant dense<0.000000e+00> : vector<8xf32>
    %13 = vector.multi_reduction <add>, %12, %cst_6 [1] : vector<8x32xf32> to vector<8xf32>
    %14 = vector.shape_cast %13 : vector<8xf32> to vector<8x1xf32>
    %cst_7 = arith.constant 3.200000e+01 : f32
    %15 = vector.broadcast %cst_7 : f32 to vector<8x1xf32>
    %16 = arith.divf %14, %15 : vector<8x1xf32>
    %17 = vector.broadcast %9 : vector<8x1xf32> to vector<8x32xf32>
    %18 = arith.subf %5, %17 : vector<8x32xf32>
    %cst_8 = arith.constant 9.99999997E-7 : f32
    %19 = vector.broadcast %cst_8 : f32 to vector<8x1xf32>
    %20 = arith.addf %16, %19 : vector<8x1xf32>
    %21 = math.rsqrt %20 : vector<8x1xf32>
    %22 = vector.broadcast %21 : vector<8x1xf32> to vector<8x32xf32>
    %23 = arith.mulf %18, %22 : vector<8x32xf32>
    %c0_9 = arith.constant 0 : index
    %c0_10 = arith.constant 0 : index
    %24 = vector.load %arg4[%c0_9, %c0_10] : memref<1x32xf32, #tpu.memory_space<vmem>>, vector<1x32xf32>
    %25 = vector.broadcast %24 : vector<1x32xf32> to vector<8x32xf32>
    %26 = arith.mulf %23, %25 : vector<8x32xf32>
    %c0_11 = arith.constant 0 : index
    %c0_12 = arith.constant 0 : index
    %27 = vector.load %arg5[%c0_11, %c0_12] : memref<1x32xf32, #tpu.memory_space<vmem>>, vector<1x32xf32>
    %28 = vector.broadcast %27 : vector<1x32xf32> to vector<8x32xf32>
    %29 = arith.addf %26, %28 : vector<8x32xf32>
    %c0_13 = arith.constant 0 : index
    %c0_14 = arith.constant 0 : index
    %c0_15 = arith.constant 0 : index
    %30 = vector.load %arg6[%c0_13, %c0_14, %c0_15] : memref<1x8x32xf32, #tpu.memory_space<vmem>>, vector<1x8x32xf32>
    %31 = vector.shape_cast %30 : vector<1x8x32xf32> to vector<8x32xf32>
    %32 = vector.shape_cast %29 : vector<8x32xf32> to vector<1x8x32xf32>
    tpu.vector_store %arg6[%c0_13, %c0_14, %c0_15], %32 {strides = array<i32>} : memref<1x8x32xf32, #tpu.memory_space<vmem>>, vector<1x8x32xf32>,
    return
  }
  func.func @transform_0(%arg0: i32, %arg1: i32) -> (i32, i32, i32) {
    %c0_i32 = arith.constant 0 : i32
    %c0_i32_0 = arith.constant 0 : i32
    return %arg0, %arg1, %c0_i32 : i32, i32, i32
  }
  func.func @transform_1(%arg0: i32, %arg1: i32) -> (i32, i32) {
    %c0_i32 = arith.constant 0 : i32
    %c0_i32_0 = arith.constant 0 : i32
    return %arg1, %c0_i32 : i32, i32
  }
  func.func @transform_2(%arg0: i32, %arg1: i32) -> (i32, i32) {
    %c0_i32 = arith.constant 0 : i32
    %c0_i32_0 = arith.constant 0 : i32
    %c0_i32_1 = arith.constant 0 : i32
    return %c0_i32, %c0_i32_0 : i32, i32
  }
  func.func @transform_3(%arg0: i32, %arg1: i32) -> (i32, i32) {
    %c0_i32 = arith.constant 0 : i32
    %c0_i32_0 = arith.constant 0 : i32
    %c0_i32_1 = arith.constant 0 : i32
    return %c0_i32, %c0_i32_0 : i32, i32
  }
  func.func @transform_4(%arg0: i32, %arg1: i32) -> (i32, i32, i32) {
    %c0_i32 = arith.constant 0 : i32
    %c0_i32_0 = arith.constant 0 : i32
    return %arg0, %arg1, %c0_i32 : i32, i32, i32
  }
}

</mosaic_0001>

<bundles_post_ra>
// kernel: tpu_custom_call.1
= control target key start
LH: loop header
LB: loop body
LE: loop exit
PB: predicated region body
PF: predicated region fallthrough
CT: control target
= control target key end

     0   :  { %9 = vsyncpa [#allocation3], 0  ;;  %s823_s0 = inlined_call_operand.hbm [shape: f32[2,8,32], index: 0, kind: input, shape index: {}]   ;;  %s824_s1 = inlined_call_operand.hbm [shape: f32[8,32], index: 1, kind: input, shape index: {}]   ;;  %s825_s2 = inlined_call_operand.vmem [shape: f32[1,32], index: 2, kind: input, shape index: {}]   ;;  %s826_s3 = inlined_call_operand.vmem [shape: f32[1,32], index: 3, kind: input, shape index: {}]   ;;  %s827_s4 = inlined_call_operand.hbm [shape: f32[2,8,32], index: 4, kind: output, shape index: {}]  }
   0x1   :  { %11 = vsyncpa [#allocation3 + $0x1], 0 }
   0x2   :  { %12 = vsyncpa [#allocation6], 0 }
   0x3   :  { %13 = vsyncpa [#allocation4], 0 }
   0x4   :  { %15 = vsyncpa [#allocation4 + $0x1], 0  ;;  %s653_s15 = smov 0   ;;  %s655_s16 = smov 0  }
   0x5   :  { %s657_s17 = smov 0   ;;  %s659_s18 = smov 0  }
   0x6   :  { %s661_s19 = smov 0   ;;  %s663_s20 = smov 0  }
   0x7 LB: > { %s393_s21 = sadd.s32 4294967295, %s623_s20   ;;  %s394_s22 = sadd.s32 4294967294, %s623_s20   ;;  %s623_s20 = sphi %s663_s20, %s21_s20   ;;  %s619_s19 = sphi %s661_s19, %s844_s19   ;;  %s615_s18 = sphi %s659_s18, %s843_s18   ;;  %s611_s17 = sphi %s657_s17, %s842_s17   ;;  %s607_s16 = sphi %s655_s16, %s841_s16   ;;  %s603_s15 = sphi %s653_s15, %s840_s15  }
   0x8   : > { %p55_p0 = scmp.ne.s32.totalorder %s607_s16, %s603_s15  ;;  %p687_p1 = scmp.eq.s32.totalorder %s393_s21, 0 }
   0x9   : > { %p691_p2 = scmp.eq.s32.totalorder %s393_s21, 1  ;;  %p155_p3 = scmp.eq.s32.totalorder %s394_s22, 1 }
   0xa   : > { %p697_p4 = por %p687_p1, %p55_p0  ;;  %p395_p5 = scmp.ge.s32.totalorder %s623_s20, 1 }
   0xb   : > { %p702_p6 = por %p155_p3, %p55_p0  ;;  %p162_p7 = scmp.lt.s32.totalorder %s623_s20, 3 }
   0xc   : > { %s831_s25 = scalar_select %p697_p4, 1, 0 }
   0xd   : > { %s832_s26 = scalar_select %p702_p6, 1, 0 }
   0xe   : > { %p707_p8 = pnand %p395_p5, %p162_p7  ;;  %s625_s28 = smov [#allocation5]  }
   0xf   : > { %s177_s29 = sshll.u32 %s625_s28, 4  ;;  %s33_s5 = sadd.s32 1, %s619_s19  ;;  %s178_s29 = int_to_ptr.vmem [resolvable:$true] %s177_s29 }
  0x10   : > { %p418_p10 = pneg %p707_p8  ;;  %s42_s6 = sadd.s32 1, %s611_s17 }
  0x11   : > { %p35_p12 = scmp.ge.s32.totalorder %s33_s5, 2  ;;  %s496_s7 = scalar_lea.vmem %s178_s29, 128 }
  0x12   : > { %p716_p11 = pnand %p418_p10, %p687_p1  ;;  %p497_p0 = scmp.ne.s32.totalorder %s178_s29, %s496_s7 }
  0x13   : > { %p504_p7 = scmp.lt.s32.totalorder %s178_s29, %s178_s29  ;;  %p505_p6 = scmp.lt.s32.totalorder %s496_s7, %s496_s7 }
  0x14   : > { %p487_p13 = pneg %p716_p11 }
  0x15   : > { %p506_p9 = por %p505_p6, %p504_p7 }
  0x16   : > { %p499_p3 = pnand %p497_p0, %p487_p13 }
  0x18   : > { %p500_p5 = pneg %p499_p3 }
  0x1a   : > { %p507_p4 = pnand %p506_p9, %p500_p5 }
  0x1c   : > { %510 = shalt.err (!%p507_p4)
}
  0x1d   : > { %421 = dma.hbm_to_vmem [thread:$0]  (!%p716_p11), %s824_s1, 128, %s178_s29, [#allocation6]  }
  0x1e   : > { %s846_s5 = smov (%p35_p12, %s33_s5), 0  ;;  %p49_p6 = scmp.ne.s32.totalorder %s611_s17, %s607_s16 }
  0x1f   : > { %p50_p4 = scmp.eq.s32.totalorder %s623_s20, 0  ;;  %s37_s10 = ssub.s32 %s619_s19, %s846_s5 }
  0x20   : > { %p431_p9 = scmp.lt.s32.totalorder %s623_s20, 2  ;;  %p40_p10 = scmp.eq.s32.totalorder %s37_s10, 0 }
  0x21   : > { %p51_p13 = por %p50_p4, %p49_p6  ;;  %p739_p0 = por %p691_p2, %p49_p6 }
  0x22   : > { %s194_s12 = sand.u32 1, %s611_s17   ;;  %s399_s21 = sshll.u32 %s619_s19, 7 }
  0x23   : > { %s745_s13 = scalar_select %p40_p10, %s611_s17, %s42_s6  }
  0x24   : > { %s398_s14 = sshll.u32 %s194_s12, 3  ;;  %s204_s29 = scalar_lea.hbm %s823_s0, %s399_s21 }
  0x25   : > { %s198_s30 = scalar_lea.vmem [#allocation2], %s398_s14  ;;  %p751_p11 = pnand %p431_p9, %p51_p13 }
  0x26   : > { %s206_s7 = sshll.u32 %s198_s30, 4  ;;  %s195_s24 = scalar_lea.sflag [#allocation3], %s194_s12  ;;  %s207_s7 = int_to_ptr.vmem [resolvable:$true] %s206_s7 }
  0x27   : > { %p513_p2 = pneg %p751_p11  ;;  %s524_s9 = scalar_lea.vmem %s207_s7, 128 }
  0x28   : > { %p525_p12 = scmp.ne.s32.totalorder %s207_s7, %s524_s9  ;;  %s626_s6 = smov [#allocation2]  }
  0x29   : > { %s529_s10 = sshll.u32 %s626_s6, 4  ;;  %s530_s10 = int_to_ptr.vmem [resolvable:$false] %s529_s10 }
  0x2a   : > { %p527_p3 = pnand %p525_p12, %p513_p2  ;;  %s531_s22 = scalar_lea.vmem %s530_s10, 256 }
  0x2b   : > { %p532_p7 = scmp.lt.s32.totalorder %s207_s7, %s530_s10  ;;  %p533_p6 = scmp.lt.s32.totalorder %s531_s22, %s524_s9 }
  0x2c   : > { %p528_p5 = pneg %p527_p3 }
  0x2d   : > { %p534_p4 = por %p533_p6, %p532_p7 }
  0x2f   : > { %p535_p10 = pnand %p534_p4, %p528_p5 }
  0x31   : > { %538 = shalt.err (!%p535_p10)
}
  0x32   : > { %425 = dma.hbm_to_vmem [thread:$0]  (!%p751_p11), %s204_s29, 128, %s207_s7, %s195_s24  }
  0x33   : > { %215 = sbr.rel (%p707_p8) target bundleno = 385 (0x181), region = 36  ;;  %s762_s12 = sand.u32 (!%p707_p8), 1, %s607_s16  }
  0x34   : > { %s401_s14 = sshll.u32 (!%p707_p8), %s762_s12, 3  ;;  %s218_s21 = scalar_lea.sflag (!%p707_p8), [#allocation3], %s762_s12 }
  0x35   : > { %s221_s28 = scalar_lea.vmem (!%p707_p8), [#allocation2], %s401_s14  ;;  %p837_p9 = scmp.ne.s32.totalorder (!%p707_p8), %s831_s25, 0 }
  0x38   : > { %590 = dma.done.wait (%p837_p9), %s218_s21, 128  }
  0x39   : > { %592 = vsyncadd (%p837_p9), %s218_s21, 4294967168 }
  0x3a   : > { %594 = dma.done.wait (%p687_p1), [#allocation6], 128  }
  0x3b   : > { %596 = vsyncadd (%p687_p1), [#allocation6], 4294967168  ;;  %v250_v0 = vld [vmem:[%s221_s28] sm:$0xff]  ;;  %v252_v1 = vld [vmem:[#allocation5] sm:$0xff]  ;;  %vm254_vm0 = vcmask 261120   ;;  %s407_s30 = sshll.u32 %s615_s18, 7 }
  0x3c   : > { %v251_v2 = vmul.f32 5.656854, %v250_v0  ;;  %v404_v14 = vld [vmem:[%s825_s2] ss:$0 sm:$0xff]  ;;  %s249_s7 = scalar_lea.vmem [#allocation7], %s401_s14  ;;  %s299_s6 = scalar_lea.hbm %s827_s4, %s407_s30 }
  0x3d   : > { %v405_v16 = vld [vmem:[%s826_s3] ss:$0 sm:$0xff]  ;;  %s301_s8 = sshll.u32 %s249_s7, 4  ;;  %s287_s10 = scalar_lea.sflag [#allocation4], %s762_s12  ;;  %s302_s8 = int_to_ptr.vmem [resolvable:$true] %s301_s8 }
  0x3e   : > { %v253_v3 = vadd.f32 %v252_v1, %v251_v2  ;;  %s539_s22 = scalar_lea.vmem %s302_s8, 128  ;;  %s627_s21 = smov [#allocation7]  }
  0x3f   : > { %p540_p1 = scmp.ne.s32.totalorder %s302_s8, %s539_s22  ;;  %s543_s28 = sshll.u32 %s627_s21, 4  ;;  %s544_s28 = int_to_ptr.vmem [resolvable:$false] %s543_s28 }
  0x40   : > { %v255_v4 = vsel %vm254_vm0, %v253_v3, 0.0  ;;  %s545_s18 = scalar_lea.vmem %s544_s28, 256  ;;  %p546_p11 = scmp.lt.s32.totalorder %s302_s8, %s544_s28 }
  0x41   : > { %256 = vadd.xlane.f32.xlu0 %v255_v4  ;;  %p541_p8 = pnand %p540_p1, %p739_p0  ;;  %p547_p2 = scmp.lt.s32.totalorder %s545_s18, %s539_s22 }
  0x43   : > { %p542_p13 = pneg %p541_p8  ;;  %p548_p12 = por %p547_p2, %p546_p11 }
  0x45   : > { %p549_p3 = pnand %p548_p12, %p542_p13 }
  0xca   : > { %v257_v5 = vpop.xlane.xlu0 %256 }
  0xcb   : > { %v259_v6 = vmul.f32 0.03125, %v257_v5 }
  0xcd   : > { %v260_v7 = vsub.f32 %v253_v3, %v259_v6 }
  0xcf   : > { %v261_v8 = vmul.f32 %v260_v7, %v260_v7 }
  0xd1   : > { %v262_v9 = vsel %vm254_vm0, %v261_v8, 0.0 }
  0xd2   : > { %263 = vadd.xlane.f32.xlu0 %v262_v9 }
 0x15b   : > { %v264_v10 = vpop.xlane.xlu0 %263 }
 0x15c   : > { %v265_v11 = vmul.f32 0.03125, %v264_v10 }
 0x15e   : > { %v266_v12 = vadd.f32 1e-06, %v265_v11 }
 0x160   : > { %483 = vrsqrt.f32 %v266_v12 }
 0x16d   : > { %v484_v13 = vpop.eup %483 }
 0x16e   : > { %v268_v15 = vmul.f32 %v484_v13, %v260_v7 }
 0x170   : > { %v276_v17 = vmul.f32 %v404_v14, %v268_v15 }
 0x172   : > { %v284_v18 = vadd.f32 %v405_v16, %v276_v17 }
 0x174   : > { %285 = vst.msk [vmem:[%s249_s7] sm:$0xff] %vm254_vm0, %v284_v18 }
 0x175   : > { %552 = shalt.err (!%p549_p3)
}
 0x176   : > { %s553_s14 = scalar_lea.hbm %s299_s6, 128  ;;  %s557_s25 = scalar_lea.hbm %s827_s4, 256 }
 0x177   : > { %p554_p5 = scmp.ne.s32.totalorder %s299_s6, %s553_s14  ;;  %p558_p4 = scmp.lt.s32.totalorder %s299_s6, %s827_s4 }
 0x178   : > { %p559_p10 = scmp.lt.s32.totalorder %s557_s25, %s553_s14 }
 0x179   : > { %p555_p7 = pnand %p554_p5, %p739_p0 }
 0x17a   : > { %p560_p9 = por %p559_p10, %p558_p4 }
 0x17b   : > { %p556_p6 = pneg %p555_p7 }
 0x17d   : > { %p561_p1 = pnand %p560_p9, %p556_p6 }
 0x17f   : > { %564 = shalt.err (!%p561_p1)
}
 0x180   : > { %416 = dma.vmem_to_hbm [thread:$0]  (%p739_p0), %s302_s8, 128, %s299_s6, %s287_s10  }
 0x181 PF: > { %s313_s30 = sand.u32 1, %s603_s15   ;;  %p838_p8 = scmp.ne.s32.totalorder %s832_s26, 0 }
 0x182   : > { %p839_p13 = scmp.ge.s32.totalorder %s623_s20, 2  ;;  %s314_s7 = scalar_lea.sflag [#allocation4], %s313_s30 }
 0x184   : > { %p427_p11 = pnand %p839_p13, %p838_p8 }
 0x186   : > { %p428_p2 = pneg %p427_p11 }
 0x188   : > { %598 = dma.done.wait (%p428_p2), %s314_s7, 128  }
 0x189   : > { %600 = vsyncadd (%p428_p2), %s314_s7, 4294967168  ;;  %s21_s20 = sadd.s32 1, %s623_s20   ;;  %s840_s15 = smov %s607_s16 }
 0x18a   : > { %p18_p12 = scmp.ge.s32.totalorder %s21_s20, 4   ;;  %s841_s16 = smov %s611_s17 }
 0x18b   : > { %s842_s17 = smov %s745_s13  ;;  %s843_s18 = smov %s619_s19 }
 0x18c   : > { %s844_s19 = smov %s846_s5  ;;  %20 = sbr.rel (!%p18_p12) target bundleno = 7 (0x7), region = 86 }
 0x191   :  { %319 = vsyncpa [#allocation3], 1 }
 0x192   :  { %321 = vsyncpa [#allocation3 + $0x1], 1 }
 0x193   :  { %322 = vsyncpa [#allocation6], 1 }
 0x194   :  { %323 = vsyncpa [#allocation4], 1 }
 0x195   :  { %325 = vsyncpa [#allocation4 + $0x1], 1 }

</bundles_post_ra>
